<compile_context>
chip_gen: v6e
topology: v6e:2x2x1
jax: 0.10.0
libtpu: 0.0.40
codegen_flags: <defaults>
</compile_context>

<pallas_src>
import numpy as np
import jax
import jax.numpy as jnp
from jax.experimental import pallas as pl
from jax.experimental.pallas import tpu as pltpu


# -----------------------------------------------------------------------------
# tiling helpers
# -----------------------------------------------------------------------------
def _vmem_budget_bytes():
    """Per-generation VMEM budget: ~48 MiB on v7x (64 MiB/TC), <=96 MiB on v5e/v6e."""
    cap = None
    try:
        cap = getattr(pltpu.get_tpu_info(), "vmem_capacity_bytes", None)
    except Exception:
        cap = None
    if not isinstance(cap, (int, float)) or not cap:
        cap = 64 * 1024 * 1024                      # conservative (v7x-sized) fallback
    return int(min(int(cap) * 3 // 4, 96 * 1024 * 1024))


def _pick_col_tile(ncol128, k_rows, co_tile, in_bytes, out_bytes, budget):
    """Largest lane-dense (multiple-of-128) column tile whose double-buffered
    blocks (+ f32 accumulator scratch) fit the per-generation VMEM budget."""
    cands = {c for c in (2048, 1024, 512, 256) if c < ncol128}
    cands.add(min(ncol128, 2048))
    cands.add(128)
    for ct in sorted(cands, reverse=True):
        need = (2 * k_rows * ct * in_bytes          # x block (double buffered)
                + 2 * co_tile * k_rows * in_bytes   # weight block
                + 2 * co_tile * ct * out_bytes      # output block
                + co_tile * ct * 4                  # f32 accumulator (tap path)
                + co_tile * 4)                      # bias
        if need <= budget:
            return ct
    return 128


# -----------------------------------------------------------------------------
# kernels
# -----------------------------------------------------------------------------
def _im2col_gemm_kernel(x_ref, w_ref, *rest):
    """One (batch, col_tile, co_tile) block: single MXU GEMM + fused bias/cast.

    x_ref: (1, K*C_in, col_tile)   w_ref: (co_tile, K*C_in)
    b_ref: (co_tile, 1) f32 (optional)   o_ref: (1, co_tile, col_tile)
    The equalized-lr scale is already folded into w_ref (review item 9).
    """
    if len(rest) == 2:
        b_ref, o_ref = rest
    else:
        (o_ref,), b_ref = rest, None
    acc = jnp.dot(w_ref[...], x_ref[0], preferred_element_type=jnp.float32)
    if b_ref is not None:
        acc = acc + b_ref[...]                      # (co_tile, 1) broadcasts over lanes
    o_ref[0] = acc.astype(o_ref.dtype)


def _tap_accum_kernel(x_ref, w_ref, *rest):
    """Per-tap matmul into a resident f32 VMEM accumulator (K = "arbitrary" axis).

    x_ref: (1, C_in, l_tile) tap-shifted window of the ORIGINAL padded input
    w_ref: (1, co_tile, C_in) one tap of the scaled weight
    b_ref: (co_tile, 1) f32 (optional)   o_ref: (1, co_tile, l_tile)
    acc_ref: (co_tile, l_tile) f32 scratch
    """
    if len(rest) == 3:
        b_ref, o_ref, acc_ref = rest
    else:
        (o_ref, acc_ref), b_ref = rest, None
    k = pl.program_id(3)

    @pl.when(k == 0)
    def _():
        acc_ref[...] = jnp.zeros_like(acc_ref)

    acc_ref[...] += jnp.dot(w_ref[0], x_ref[0], preferred_element_type=jnp.float32)

    @pl.when(k == pl.num_programs(3) - 1)
    def _():
        res = acc_ref[...]
        if b_ref is not None:
            res = res + b_ref[...]
        o_ref[0] = res.astype(o_ref.dtype)


# -----------------------------------------------------------------------------
# wrapper
# -----------------------------------------------------------------------------
def equalized_conv1d(x, weight, bias=None, *, stride=1, padding=0, use_bias=True,
                     precision="bf16", out_dtype=None):
    """Pallas TPU EqualizedConv1d.forward == F.conv1d(x, weight*scale, bias, stride, padding).

    precision: "bf16" (default; bf16 MXU operands, f32 accumulation/epilogue) or
               "float32" (feed f32 operands to the MXU).
    out_dtype: output dtype; default x.dtype (pass jnp.bfloat16 to halve writeback).
    """
    N, C_in, L = x.shape
    C_out, c_in_w, K = weight.shape
    assert c_in_w == C_in
    fan_in = K * C_in
    scale = float(np.sqrt(2.0) / np.sqrt(fan_in))

    L_padded = L + 2 * padding
    L_out = (L_padded - K) // stride + 1
    assert L_out >= 1

    in_dtype = jnp.bfloat16 if precision == "bf16" else jnp.float32
    out_dtype = x.dtype if out_dtype is None else np.dtype(out_dtype)
    in_bytes = np.dtype(in_dtype).itemsize
    out_bytes = np.dtype(out_dtype).itemsize
    budget = _vmem_budget_bytes()

    # Equalized-lr scale folded into the tiny weight once, in f32, before the cast.
    w_scaled = weight.astype(jnp.float32) * scale

    # bias=None (even with use_bias=True, where PyTorch's bias is all-zero) goes
    # through the no-bias path: no dead operand is allocated or DMA'd.
    have_bias = bool(use_bias) and bias is not None
    b2 = bias.astype(jnp.float32).reshape(C_out, 1) if have_bias else None

    # C_out tile: full C_out when moderate, else 512.  co is the innermost grid
    # axis, so the large x column block stays VMEM-resident across C_out tiles.
    co_tile = C_out if C_out <= 512 else 512

    # ------------------------------------------------------------------ path B
    # stride-1, deep-channel convs: no im2col in HBM at all (review item 1).
    if stride == 1 and K > 1 and C_in >= 128 and L_out >= 512:
        l_tile = _pick_col_tile(128 * pl.cdiv(L_out, 128), C_in, co_tile,
                                in_bytes, out_bytes, budget)
        L_out_pad = l_tile * pl.cdiv(L_out, l_tile)
        # Right-pad so every tap window [j*l_tile + k, +l_tile) stays in bounds.
        x_p = jnp.pad(x.astype(in_dtype),
                      ((0, 0), (0, 0), (padding, padding + (L_out_pad - L_out))))
        w3 = jnp.transpose(w_scaled, (2, 0, 1)).astype(in_dtype)   # (K, C_out, C_in)

        grid = (N, pl.cdiv(C_out, co_tile), L_out_pad // l_tile, K)
        in_specs = [
            # tap shift expressed as an element offset on the column axis: the
            # pipeline streams windows of the original x (no HBM im2col copy).
            pl.BlockSpec((1, C_in, pl.Element(l_tile)),
                         lambda n, i, j, k: (n, 0, j * l_tile + k)),
            pl.BlockSpec((1, co_tile, C_in), lambda n, i, j, k: (k, i, 0)),
        ]
        operands = [x_p, w3]
        if have_bias:
            in_specs.append(pl.BlockSpec((co_tile, 1), lambda n, i, j, k: (i, 0)))
            operands.append(b2)

        out = pl.pallas_call(
            _tap_accum_kernel,
            out_shape=jax.ShapeDtypeStruct((N, C_out, L_out_pad), out_dtype),
            grid=grid,
            in_specs=in_specs,
            out_specs=pl.BlockSpec((1, co_tile, l_tile), lambda n, i, j, k: (n, i, j)),
            scratch_shapes=[pltpu.VMEM((co_tile, l_tile), jnp.float32)],
            compiler_params=pltpu.CompilerParams(
                dimension_semantics=("parallel", "parallel", "parallel", "arbitrary"),
                vmem_limit_bytes=budget),
        )(*operands)
        return out[:, :, :L_out] if L_out_pad != L_out else out

    # ------------------------------------------------------------------ path A
    # General path (any stride / small fan-in, e.g. the spec'd module config):
    # one lane-dense bf16 GEMM per block over an im2col matrix built in a single
    # fused bf16 pass (cast -> pad -> tap windows -> stack; layout only, no FLOPs).
    x_p = jnp.pad(x.astype(in_dtype), ((0, 0), (0, 0), (padding, padding)))
    taps = []
    for k in range(K):
        taps.append(jax.lax.slice_in_dim(               # (N, C_in, L_out), tap k
            x_p, k, k + stride * (L_out - 1) + 1, stride=stride, axis=2))
    xcol = jnp.concatenate(taps, axis=1)                # (N, K*C_in, L_out), rows k*C_in+ci

    w2 = (jnp.transpose(w_scaled, (0, 2, 1))            # (C_out, K, C_in)
          .reshape(C_out, K * C_in).astype(in_dtype))   # columns match xcol rows

    direct_ncl = L_out >= 512        # write (N, C_out, L_out) directly (review item 4)
    if direct_ncl:
        b_eff, ncol = N, L_out
    else:
        # short outputs: fold batch into the column axis for lane density
        b_eff, ncol = 1, N * L_out
        xcol = jnp.transpose(xcol, (1, 0, 2)).reshape(1, K * C_in, N * L_out)

    ncol128 = 128 * pl.cdiv(ncol, 128)
    col_tile = _pick_col_tile(ncol128, K * C_in, co_tile, in_bytes, out_bytes, budget)
    # v7x megacore: if the whole problem is one block, split the column axis so
    # both TensorCores get work (review item 8; harmless on single-TC chips).
    if (b_eff == 1 and pl.cdiv(C_out, co_tile) == 1
            and pl.cdiv(ncol, col_tile) == 1 and ncol128 >= 256):
        col_tile = 128 * pl.cdiv(pl.cdiv(ncol, 128), 2)
    ncol_pad = col_tile * pl.cdiv(ncol, col_tile)
    if ncol_pad != ncol:
        xcol = jnp.pad(xcol, ((0, 0), (0, 0), (0, ncol_pad - ncol)))

    # co innermost: x column block resident, small weight tile re-streamed.
    grid = (b_eff, ncol_pad // col_tile, pl.cdiv(C_out, co_tile))
    in_specs = [
        pl.BlockSpec((1, K * C_in, col_tile), lambda b, j, i: (b, 0, j)),
        pl.BlockSpec((co_tile, K * C_in), lambda b, j, i: (i, 0)),
    ]
    operands = [xcol, w2]
    if have_bias:
        in_specs.append(pl.BlockSpec((co_tile, 1), lambda b, j, i: (i, 0)))
        operands.append(b2)

    out_flat = pl.pallas_call(
        _im2col_gemm_kernel,
        out_shape=jax.ShapeDtypeStruct((b_eff, C_out, ncol_pad), out_dtype),
        grid=grid,
        in_specs=in_specs,
        out_specs=pl.BlockSpec((1, co_tile, col_tile), lambda b, j, i: (b, i, j)),
        compiler_params=pltpu.CompilerParams(
            dimension_semantics=("parallel", "parallel", "parallel"),
            vmem_limit_bytes=budget),
    )(*operands)

    # NOTE: zero-padded columns carry the bias value; they are sliced off below
    # and never observable by callers.
    if direct_ncl:
        return out_flat[:, :, :L_out] if ncol_pad != L_out else out_flat
    out = out_flat[0, :, :ncol].reshape(C_out, N, L_out)
    return jnp.transpose(out, (1, 0, 2))


# -----------------------------------------------------------------------------
# pure-JAX reference (mirrors F.conv1d(x, weight*scale, bias, stride, padding))
# -----------------------------------------------------------------------------
def _reference(x, weight, bias, *, stride, padding, use_bias, quantize=False):
    C_out, C_in, K = weight.shape
    scale = np.sqrt(2.0) / np.sqrt(K * C_in)
    w = weight.astype(jnp.float32) * scale
    xx = x.astype(jnp.float32)
    if quantize:   # mirror the kernel's bf16 MXU operands (f32 accumulation)
        w = w.astype(jnp.bfloat16).astype(jnp.float32)
        xx = xx.astype(jnp.bfloat16).astype(jnp.float32)
    out = jax.lax.conv_general_dilated(
        xx, w, window_strides=(stride,), padding=[(padding, padding)],
        dimension_numbers=("NCH", "OIH", "NCH"),
        precision=jax.lax.Precision.HIGHEST)
    if use_bias and bias is not None:
        out = out + bias[None, :, None]
    return out


if __name__ == "__main__":
    key = jax.random.PRNGKey(0)
    kx, kw, kb, kx2 = jax.random.split(key, 4)

    # Module config from the spec: c_in=4, c_out=8, kernel_size=3, stride=2, padding=1, bias=True
    N, C_in, C_out, L, K = 2, 4, 8, 16, 3
    stride, padding = 2, 1
    x = jax.random.normal(kx, (N, C_in, L), jnp.float32)
    weight = jax.random.normal(kw, (C_out, C_in, K), jnp.float32)   # nn.init.normal_
    bias = 0.1 * jax.random.normal(kb, (C_out,), jnp.float32)       # exercise the bias path

    # 1) spec'd config: batch-folded lane-dense GEMM path, bias, f32 output
    out1 = jax.block_until_ready(
        equalized_conv1d(x, weight, bias, stride=stride, padding=padding, use_bias=True))
    L_out = (L + 2 * padding - K) // stride + 1
    assert out1.shape == (N, C_out, L_out) and out1.dtype == x.dtype
    ref1q = _reference(x, weight, bias, stride=stride, padding=padding, use_bias=True, quantize=True)
    ref1f = _reference(x, weight, bias, stride=stride, padding=padding, use_bias=True)
    assert np.allclose(np.asarray(out1), np.asarray(ref1q), atol=2e-3, rtol=2e-3)
    assert np.allclose(np.asarray(out1), np.asarray(ref1f), atol=5e-2, rtol=5e-2)

    # 2) no-bias, stride 1, bf16 output (halved writeback; review item 3)
    out2 = jax.block_until_ready(
        equalized_conv1d(x, weight, None, stride=1, padding=1, use_bias=False,
                         out_dtype=jnp.bfloat16))
    assert out2.shape == (N, C_out, L) and out2.dtype == jnp.bfloat16
    ref2 = _reference(x, weight, None, stride=1, padding=1, use_bias=False, quantize=True)
    assert np.allclose(np.asarray(out2.astype(jnp.float32)), np.asarray(ref2),
                       atol=2e-2, rtol=2e-2)

    # 3) long sequence (L_out >= 512): direct (N, C_out, L_out) write, no transpose
    L3 = 1029
    x3 = jax.random.normal(kx2, (N, C_in, L3), jnp.float32)
    out3 = jax.block_until_ready(
        equalized_conv1d(x3, weight, bias, stride=2, padding=1, use_bias=True))
    L3_out = (L3 + 2 - K) // 2 + 1
    assert out3.shape == (N, C_out, L3_out)
    ref3 = _reference(x3, weight, bias, stride=2, padding=1, use_bias=True, quantize=True)
    assert np.allclose(np.asarray(out3), np.asarray(ref3), atol=2e-3, rtol=2e-3)

    print("KERNEL_OK")
</pallas_src>

<mosaic_0001>
module attributes {stable_mosaic.version = 11 : i64} {
  func.func @_im2col_gemm_kernel(%arg0: i32, %arg1: i32, %arg2: i32, %arg3: memref<1x12x128xbf16, #tpu.memory_space<vmem>>, %arg4: memref<8x12xbf16, #tpu.memory_space<vmem>>, %arg5: memref<8x1xf32, #tpu.memory_space<vmem>>, %arg6: memref<1x8x128xf32, #tpu.memory_space<vmem>>) attributes {dimension_semantics = [#tpu.dimension_semantics<parallel>, #tpu.dimension_semantics<parallel>, #tpu.dimension_semantics<parallel>], iteration_bounds = array<i64: 1, 1, 1>, scalar_prefetch = 0 : i64, scratch_operands = 0 : i64, tpu.core_type = #tpu.core_type<tc>, window_params = [{transform_indices = @transform_0, window_bounds = array<i64: 1, 12, 128>}, {transform_indices = @transform_1, window_bounds = array<i64: 8, 12>}, {transform_indices = @transform_2, window_bounds = array<i64: 8, 1>}, {transform_indices = @transform_3, window_bounds = array<i64: 1, 8, 128>}]} {
    %c0 = arith.constant 0 : index
    %c0_0 = arith.constant 0 : index
    %0 = vector.load %arg4[%c0, %c0_0] : memref<8x12xbf16, #tpu.memory_space<vmem>>, vector<8x12xbf16>
    %c0_1 = arith.constant 0 : index
    %c0_2 = arith.constant 0 : index
    %c0_3 = arith.constant 0 : index
    %1 = vector.load %arg3[%c0_1, %c0_2, %c0_3] : memref<1x12x128xbf16, #tpu.memory_space<vmem>>, vector<1x12x128xbf16>
    %2 = vector.shape_cast %1 : vector<1x12x128xbf16> to vector<12x128xbf16>
    %cst = arith.constant dense<0.000000e+00> : vector<8x128xf32>
    %3 = tpu.matmul %0, %2, %cst {dimension_numbers = #tpu.dot_dimension_numbers<[1], [0], [0], [1], [0, 0, 1, 1], [], []>} : vector<8x12xbf16>, vector<12x128xbf16>, vector<8x128xf32> -> vector<8x128xf32>
    %c0_4 = arith.constant 0 : index
    %c0_5 = arith.constant 0 : index
    %4 = vector.load %arg5[%c0_4, %c0_5] : memref<8x1xf32, #tpu.memory_space<vmem>>, vector<8x1xf32>
    %5 = vector.broadcast %4 : vector<8x1xf32> to vector<8x128xf32>
    %6 = arith.addf %3, %5 : vector<8x128xf32>
    %c0_6 = arith.constant 0 : index
    %c0_7 = arith.constant 0 : index
    %c0_8 = arith.constant 0 : index
    %7 = vector.load %arg6[%c0_6, %c0_7, %c0_8] : memref<1x8x128xf32, #tpu.memory_space<vmem>>, vector<1x8x128xf32>
    %8 = vector.shape_cast %7 : vector<1x8x128xf32> to vector<8x128xf32>
    %9 = vector.shape_cast %6 : vector<8x128xf32> to vector<1x8x128xf32>
    tpu.vector_store %arg6[%c0_6, %c0_7, %c0_8], %9 {strides = array<i32>} : memref<1x8x128xf32, #tpu.memory_space<vmem>>, vector<1x8x128xf32>,
    return
  }
  func.func @transform_0(%arg0: i32, %arg1: i32, %arg2: i32) -> (i32, i32, i32) {
    %c0_i32 = arith.constant 0 : i32
    %c0_i32_0 = arith.constant 0 : i32
    return %arg0, %c0_i32, %arg1 : i32, i32, i32
  }
  func.func @transform_1(%arg0: i32, %arg1: i32, %arg2: i32) -> (i32, i32) {
    %c0_i32 = arith.constant 0 : i32
    %c0_i32_0 = arith.constant 0 : i32
    return %arg2, %c0_i32 : i32, i32
  }
  func.func @transform_2(%arg0: i32, %arg1: i32, %arg2: i32) -> (i32, i32) {
    %c0_i32 = arith.constant 0 : i32
    %c0_i32_0 = arith.constant 0 : i32
    return %arg2, %c0_i32 : i32, i32
  }
  func.func @transform_3(%arg0: i32, %arg1: i32, %arg2: i32) -> (i32, i32, i32) {
    %c0_i32 = arith.constant 0 : i32
    return %arg0, %arg2, %arg1 : i32, i32, i32
  }
}

</mosaic_0001>

<bundles_post_ra>
// kernel: tpu_custom_call.1
= control target key start
LH: loop header
LB: loop body
LE: loop exit
PB: predicated region body
PF: predicated region fallthrough
CT: control target
= control target key end

     0   :  { %8 = vsyncpa [#allocation3], 0  ;;  %s204_s0 = inlined_call_operand.vmem [shape: bf16[1,12,128], index: 0, kind: input, shape index: {}]   ;;  %s205_s1 = inlined_call_operand.hbm [shape: bf16[8,12], index: 1, kind: input, shape index: {}]   ;;  %s206_s2 = inlined_call_operand.vmem [shape: f32[8,1], index: 2, kind: input, shape index: {}]   ;;  %s207_s3 = inlined_call_operand.hbm [shape: f32[1,8,128], index: 3, kind: output, shape index: {}]  }
   0x1   :  { %9 = vsyncpa [#allocation4], 0  ;;  %s167_s12 = smov [#allocation2]  }
   0x2   :  { %s18_s13 = sshll.u32 %s167_s12, 4  ;;  %s19_s13 = int_to_ptr.vmem [resolvable:$true] %s18_s13 }
   0x3   :  { %s131_s14 = scalar_lea.vmem %s19_s13, 64  ;;  %p136_p1 = scmp.lt.s32.totalorder %s19_s13, %s19_s13 }
   0x4   :  { %p132_p0 = scmp.ne.s32.totalorder %s19_s13, %s131_s14  ;;  %p137_p2 = scmp.lt.s32.totalorder %s131_s14, %s131_s14 }
   0x6   :  { %p138_p3 = por %p137_p2, %p136_p1 }
   0x8   :  { %p139_p4 = pnand %p138_p3, %p132_p0 }
   0xa   :  { %142 = shalt.err (!%p139_p4)
}
   0xb   :  { %21 = dma.hbm_to_vmem [thread:$0]  %s205_s1, 64, %s19_s13, [#allocation3]  }
   0xc   :  { %163 = dma.done.wait [#allocation3], 64  }
   0xd   :  { %164 = vsyncadd [#allocation3], 4294967232  ;;  %v168_v0 = vmov 0.0   ;;  %vm169_vm0 = vmmov 0   ;;  %v170_v1 = vmov 0   ;;  %vm46_vm1 = vcmask 1045504  }
   0xe   :  { %110 = vmatprep.subr.bf16.mxu0 %v168_v0  ;;  %112 = vmatprep.mubr.msk.bf16.mxu0 %vm169_vm0, %v168_v0  ;;  %v122_v2 = vld [vmem:[%s204_s0] sm:$0x3f]   ;;  %vm42_vm2 = vcmask 97280   ;;  %s171_s1 = smov [#allocation5]  }
   0xf   :  { %121 = vset.pattern.permute.xlu0 %v170_v1  ;;  %v31_v3 = vld [vmem:[%s206_s2] sm:$0xff]  ;;  %v48_v4 = vsel %vm46_vm1, %v122_v2, 0  ;;  %s97_s21 = sshll.u32 %s171_s1, 4  ;;  %s98_s21 = int_to_ptr.vmem [resolvable:$true] %s97_s21 }
  0x10   :  { %34 = vperm.xlu0 %121, %v31_v3   ;;  %111 = vmatpush3.bf16.msra.mxu0 %v48_v4  ;;  %v28_v5 = vld [vmem:[#allocation2] sm:$0xf]  ;;  %s143_s0 = scalar_lea.vmem %s98_s21, 128  ;;  %p148_p6 = scmp.lt.s32.totalorder %s98_s21, %s98_s21 }
  0x11   :  { %p144_p5 = scmp.ne.s32.totalorder %s98_s21, %s143_s0  ;;  %p149_p7 = scmp.lt.s32.totalorder %s143_s0, %s143_s0 }
  0x13   :  { %113 = vmatmul.mubr.msk.bf16.vlgmr.msra.gmra.mxu0 %vm42_vm2, %v28_v5  ;;  %p150_p8 = por %p149_p7, %p148_p6 }
  0x15   :  { %p151_p9 = pnand %p150_p8, %p144_p5 }
  0x8b   :  { %v35_v6 = vpop.permute.xlu0 %34 }
  0xd3   :  { %v84_v7 = vpop.f32.mrf.mxu0 }
  0xd4   :  { %v85_v8 = vadd.f32 %v84_v7, %v35_v6 }
  0xd5   :  { %v114_v9 = vpop.f32.mrf.mxu0 }
  0xd6   :  { %90 = vst [vmem:[#allocation5] sm:$0xff] %v85_v8 }
  0xd7   :  { %v87_v10 = vpop.f32.mrf.mxu0 }
  0xd8   :  { %154 = shalt.err (!%p151_p9)
}
  0xd9   :  { %100 = dma.vmem_to_hbm [thread:$0]  %s98_s21, 128, %s207_s3, [#allocation4]   ;;  %v115_v11 = vpop.f32.mrf.mxu0 }
  0xda   :  { %165 = dma.done.wait [#allocation4], 128  }
  0xdb   :  { %166 = vsyncadd [#allocation4], 4294967168 }
  0xdc   :  { %104 = vsyncpa [#allocation3], 1 }
  0xdd   :  { %105 = vsyncpa [#allocation4], 1 }

</bundles_post_ra>
